<compile_context>
chip_gen: v6e
topology: v6e:2x2x1
jax: 0.10.0
libtpu: 0.0.40
codegen_flags: <defaults>
</compile_context>

<pallas_src>
import jax
import jax.numpy as jnp
from jax import lax
from jax.experimental import pallas as pl
from jax.experimental.pallas import tpu as pltpu


def autoencoder_kernel(x_ref, w_ref, b_ref, bT_ref, o_ref):
    x = x_ref[...]                        # (TB, D)  f32 activation tile
    w_bf = w_ref[...]                     # (Hp, D)  bf16 tied weight (resident)
    b = b_ref[...]                        # (1, Hp)  f32 encoder bias
    b_T = bT_ref[...]                     # (1, D)   f32 decoder bias

    # Encoder: x @ w.T + b — contraction on w's LAST axis (no materialized
    # transpose, XLU stays free); bf16 MXU inputs, f32 accumulation.
    h = lax.dot_general(
        x.astype(jnp.bfloat16), w_bf,
        dimension_numbers=(((1,), (1,)), ((), ())),
        preferred_element_type=jnp.float32,
    ) + b                                 # (TB, Hp) f32

    h = jnp.tanh(h)                       # f32 epilogue (EUP)

    # Decoder (tied weight): h @ w + b_T.
    y = lax.dot_general(
        h.astype(jnp.bfloat16), w_bf,
        dimension_numbers=(((1,), (0,)), ((), ())),
        preferred_element_type=jnp.float32,
    ) + b_T                               # (TB, D) f32

    o_ref[...] = y.astype(o_ref.dtype)


def _round_up(x, m):
    return (x + m - 1) // m * m


def _round_down_to(x, m):
    return max(m, (x // m) * m)


def _vmem_capacity_bytes():
    try:
        return int(pltpu.get_tpu_info().vmem_capacity_bytes)
    except Exception:
        return 64 << 20     # conservative default: v7x has 64 MiB per TensorCore


def _vmem_budget_bytes(tb, d, hp):
    """Conservative VMEM estimate (assumes double-buffered resident operands)."""
    stream = 2 * tb * d * 4 + 2 * tb * d * 4            # x / out tiles, 2 buffers each
    resident = 2 * (hp * d * 2 + hp * 4 + d * 4)        # bf16 weight + f32 biases
    interm = tb * d * 2 + tb * hp * 4 + tb * hp * 2 + tb * d * 4  # x_bf, h, h_bf, y
    return stream + resident + interm + (1 << 20)       # +1 MiB headroom


def _pick_block_b(batch, d, hp, fit_limit):
    # Target ~4 MiB streamed x tiles for DMA efficiency; multiple of 8; never
    # larger than the (8-padded) batch; shrink until the VMEM budget fits.
    tb = _round_down_to((4 << 20) // (4 * d), 8)
    tb = min(tb, _round_up(batch, 8))
    tb = max(tb, 8)
    while tb > 8 and _vmem_budget_bytes(tb, d, hp) > fit_limit:
        tb = _round_down_to(tb // 2, 8)
    return tb


def autoencoder_forward(x, w, b, b_T, *, block_b=None):
    """y = tanh(x @ w.T + b) @ w + b_T  (tied-weight autoencoder forward)."""
    B, D = x.shape
    H, D_w = w.shape
    assert D_w == D, "tied-weight autoencoder requires w.shape[1] == x.shape[1]"

    cap = _vmem_capacity_bytes()
    fit_limit = int(cap * 0.8)

    # --- Pad H to a lane/MXU-friendly width (exact: padded rows are zero). ---
    Hp = max(256, _round_up(H, 128))
    if Hp != H:
        w_p = jnp.zeros((Hp, D), w.dtype).at[:H, :].set(w)
        b_p = jnp.zeros((Hp,), b.dtype).at[:H].set(b.reshape(H))
    else:
        w_p = w
        b_p = b.reshape(H)
    w_bf = w_p.astype(jnp.bfloat16)            # pre-cast once; kernel never casts w
    b2d = b_p.reshape(1, Hp).astype(jnp.float32)
    bT2d = b_T.reshape(1, D).astype(jnp.float32)

    # --- Batch tiling: fixed multiple-of-8 tile + zero-padded batch. ---
    if block_b is None:
        block_b = _pick_block_b(B, D, Hp, fit_limit)
    block_b = max(8, _round_down_to(int(block_b), 8))
    B_pad = _round_up(B, block_b)
    if B_pad != B:
        x_in = jnp.zeros((B_pad, D), x.dtype).at[:B, :].set(x)
    else:
        x_in = x
    grid = (B_pad // block_b,)

    vmem_bytes = min(max(_vmem_budget_bytes(block_b, D, Hp), 8 << 20),
                     int(cap * 0.9))

    cost = pl.CostEstimate(
        flops=4 * B_pad * Hp * D,              # two matmuls, 2*B*Hp*D flops each
        transcendentals=B_pad * Hp,            # tanh
        bytes_accessed=(4 * B_pad * D          # x
                        + 4 * B_pad * D        # out
                        + 2 * Hp * D           # bf16 weight
                        + 4 * Hp + 4 * D),     # biases
    )

    def run(single_buffer_resident):
        if single_buffer_resident:
            def resident(shape):
                return pl.BlockSpec(shape, lambda i: (0, 0),
                                    pipeline_mode=pl.Buffered(1))
        else:
            def resident(shape):
                return pl.BlockSpec(shape, lambda i: (0, 0))

        out = pl.pallas_call(
            autoencoder_kernel,
            out_shape=jax.ShapeDtypeStruct((B_pad, D), jnp.float32),
            grid=grid,
            in_specs=[
                pl.BlockSpec((block_b, D), lambda i: (i, 0)),  # stream x tiles
                resident((Hp, D)),                             # tied weight (bf16)
                resident((1, Hp)),                             # encoder bias
                resident((1, D)),                              # decoder bias
            ],
            out_specs=pl.BlockSpec((block_b, D), lambda i: (i, 0)),
            compiler_params=pltpu.CompilerParams(
                dimension_semantics=("parallel",),   # megacore split on v7x
                vmem_limit_bytes=vmem_bytes,
            ),
            cost_estimate=cost,
        )(x_in, w_bf, b2d, bT2d)
        return jax.block_until_ready(out)

    try:
        y = run(single_buffer_resident=True)
    except Exception:
        # pipeline_mode=pl.Buffered(1) not supported on this jax/backend;
        # fall back to default (double-buffered) resident operands.
        y = run(single_buffer_resident=False)

    return y[:B] if B_pad != B else y


if __name__ == "__main__":
    # Small shapes consistent with the module (flat-feature linear autoencoder).
    # D lane-dense (multiple of 128); H=32 exercises the H-padding path;
    # block_b auto-sizes to the full (16-row) batch -> a single grid step.
    B, D, H = 16, 128, 32

    key = jax.random.PRNGKey(0)
    kx, kw, kb, kbt = jax.random.split(key, 4)

    # Deterministic synthetic parameters (stand-in for linear_param_generator).
    x = jax.random.normal(kx, (B, D), dtype=jnp.float32)
    w = jax.random.normal(kw, (H, D), dtype=jnp.float32) * 0.1   # nn.Linear weight layout
    b = jax.random.normal(kb, (H,), dtype=jnp.float32) * 0.1
    b_T = jax.random.normal(kbt, (1, D), dtype=jnp.float32) * 0.1  # randn(1, w.shape[1])

    out = autoencoder_forward(x, w, b, b_T)
    out = jax.block_until_ready(out)

    # References: exact PyTorch f32 semantics, and a bf16-matmul-matched one.
    ref_f32 = jnp.tanh(x @ w.T + b) @ w + b_T
    h_bf = jnp.tanh(
        lax.dot_general(x.astype(jnp.bfloat16), w.astype(jnp.bfloat16),
                        dimension_numbers=(((1,), (1,)), ((), ())),
                        preferred_element_type=jnp.float32) + b)
    ref_bf = lax.dot_general(h_bf.astype(jnp.bfloat16), w.astype(jnp.bfloat16),
                             dimension_numbers=(((1,), (0,)), ((), ())),
                             preferred_element_type=jnp.float32) + b_T

    assert out.shape == (B, D)
    assert jnp.allclose(out, ref_bf, atol=1e-2, rtol=1e-2), "mismatch vs bf16-matched reference"
    assert jnp.allclose(out, ref_f32, atol=5e-2, rtol=5e-2), "mismatch vs f32 reference"

    print("KERNEL_OK")
</pallas_src>

<mosaic_0001>
module attributes {stable_mosaic.version = 11 : i64} {
  func.func @autoencoder_kernel(%arg0: i32, %arg1: memref<16x128xf32, #tpu.memory_space<vmem>>, %arg2: memref<256x128xbf16, #tpu.memory_space<vmem>>, %arg3: memref<1x256xf32, #tpu.memory_space<vmem>>, %arg4: memref<1x128xf32, #tpu.memory_space<vmem>>, %arg5: memref<16x128xf32, #tpu.memory_space<vmem>>) attributes {dimension_semantics = [#tpu.dimension_semantics<parallel>], iteration_bounds = array<i64: 1>, scalar_prefetch = 0 : i64, scratch_operands = 0 : i64, tpu.core_type = #tpu.core_type<tc>, window_params = [{transform_indices = @transform_0, window_bounds = array<i64: 16, 128>}, {pipeline_mode = #tpu.pipeline_mode<synchronous>, transform_indices = @transform_1, window_bounds = array<i64: 256, 128>}, {pipeline_mode = #tpu.pipeline_mode<synchronous>, transform_indices = @transform_2, window_bounds = array<i64: 1, 256>}, {pipeline_mode = #tpu.pipeline_mode<synchronous>, transform_indices = @transform_3, window_bounds = array<i64: 1, 128>}, {transform_indices = @transform_4, window_bounds = array<i64: 16, 128>}]} {
    %c0 = arith.constant 0 : index
    %c0_0 = arith.constant 0 : index
    %0 = vector.load %arg1[%c0, %c0_0] : memref<16x128xf32, #tpu.memory_space<vmem>>, vector<16x128xf32>
    %c0_1 = arith.constant 0 : index
    %c0_2 = arith.constant 0 : index
    %1 = vector.load %arg2[%c0_1, %c0_2] : memref<256x128xbf16, #tpu.memory_space<vmem>>, vector<256x128xbf16>
    %c0_3 = arith.constant 0 : index
    %c0_4 = arith.constant 0 : index
    %2 = vector.load %arg3[%c0_3, %c0_4] : memref<1x256xf32, #tpu.memory_space<vmem>>, vector<1x256xf32>
    %c0_5 = arith.constant 0 : index
    %c0_6 = arith.constant 0 : index
    %3 = vector.load %arg4[%c0_5, %c0_6] : memref<1x128xf32, #tpu.memory_space<vmem>>, vector<1x128xf32>
    %4 = arith.truncf %0 : vector<16x128xf32> to vector<16x128xbf16>
    %cst = arith.constant dense<0.000000e+00> : vector<16x256xf32>
    %5 = tpu.matmul %4, %1, %cst {dimension_numbers = #tpu.dot_dimension_numbers<[1], [1], [0], [0], [0, 0, 1, 0], [], []>} : vector<16x128xbf16>, vector<256x128xbf16>, vector<16x256xf32> -> vector<16x256xf32>
    %6 = vector.broadcast %2 : vector<1x256xf32> to vector<16x256xf32>
    %7 = arith.addf %5, %6 : vector<16x256xf32>
    %8 = math.tanh %7 : vector<16x256xf32>
    %9 = arith.truncf %8 : vector<16x256xf32> to vector<16x256xbf16>
    %cst_7 = arith.constant dense<0.000000e+00> : vector<16x128xf32>
    %10 = tpu.matmul %9, %1, %cst_7 {dimension_numbers = #tpu.dot_dimension_numbers<[1], [0], [0], [1], [0, 0, 1, 1], [], []>} : vector<16x256xbf16>, vector<256x128xbf16>, vector<16x128xf32> -> vector<16x128xf32>
    %11 = vector.broadcast %3 : vector<1x128xf32> to vector<16x128xf32>
    %12 = arith.addf %10, %11 : vector<16x128xf32>
    %c0_8 = arith.constant 0 : index
    %c0_9 = arith.constant 0 : index
    %13 = vector.load %arg5[%c0_8, %c0_9] : memref<16x128xf32, #tpu.memory_space<vmem>>, vector<16x128xf32>
    tpu.vector_store %arg5[%c0_8, %c0_9], %12 {strides = array<i32>} : memref<16x128xf32, #tpu.memory_space<vmem>>, vector<16x128xf32>,
    return
  }
  func.func @transform_0(%arg0: i32) -> (i32, i32) {
    %c0_i32 = arith.constant 0 : i32
    %c0_i32_0 = arith.constant 0 : i32
    return %arg0, %c0_i32 : i32, i32
  }
  func.func @transform_1(%arg0: i32) -> (i32, i32) {
    %c0_i32 = arith.constant 0 : i32
    %c0_i32_0 = arith.constant 0 : i32
    %c0_i32_1 = arith.constant 0 : i32
    return %c0_i32, %c0_i32_0 : i32, i32
  }
  func.func @transform_2(%arg0: i32) -> (i32, i32) {
    %c0_i32 = arith.constant 0 : i32
    %c0_i32_0 = arith.constant 0 : i32
    %c0_i32_1 = arith.constant 0 : i32
    return %c0_i32, %c0_i32_0 : i32, i32
  }
  func.func @transform_3(%arg0: i32) -> (i32, i32) {
    %c0_i32 = arith.constant 0 : i32
    %c0_i32_0 = arith.constant 0 : i32
    %c0_i32_1 = arith.constant 0 : i32
    return %c0_i32, %c0_i32_0 : i32, i32
  }
  func.func @transform_4(%arg0: i32) -> (i32, i32) {
    %c0_i32 = arith.constant 0 : i32
    %c0_i32_0 = arith.constant 0 : i32
    return %arg0, %c0_i32 : i32, i32
  }
}

module attributes {stable_mosaic.version = 11 : i64} {
  func.func @autoencoder_kernel(%arg0: i32, %arg1: memref<16x128xf32, #tpu.memory_space<vmem>>, %arg2: memref<256x128xbf16, #tpu.memory_space<vmem>>, %arg3: memref<1x256xf32, #tpu.memory_space<vmem>>, %arg4: memref<1x128xf32, #tpu.memory_space<vmem>>, %arg5: memref<16x128xf32, #tpu.memory_space<vmem>>) attributes {dimension_semantics = [#tpu.dimension_semantics<parallel>], iteration_bounds = array<i64: 1>, scalar_prefetch = 0 : i64, scratch_operands = 0 : i64, tpu.core_type = #tpu.core_type<tc>, window_params = [{transform_indices = @transform_0, window_bounds = array<i64: 16, 128>}, {pipeline_mode = #tpu.pipeline_mode<synchronous>, transform_indices = @transform_1, window_bounds = array<i64: 256, 128>}, {pipeline_mode = #tpu.pipeline_mode<synchronous>, transform_indices = @transform_2, window_bounds = array<i64: 1, 256>}, {pipeline_mode = #tpu.pipeline_mode<synchronous>, transform_indices = @transform_3, window_bounds = array<i64: 1, 128>}, {transform_indices = @transform_4, window_bounds = array<i64: 16, 128>}]} {
    %c0 = arith.constant 0 : index
    %c0_0 = arith.constant 0 : index
    %0 = vector.load %arg1[%c0, %c0_0] : memref<16x128xf32, #tpu.memory_space<vmem>>, vector<16x128xf32>
    %c0_1 = arith.constant 0 : index
    %c0_2 = arith.constant 0 : index
    %1 = vector.load %arg2[%c0_1, %c0_2] : memref<256x128xbf16, #tpu.memory_space<vmem>>, vector<256x128xbf16>
    %c0_3 = arith.constant 0 : index
    %c0_4 = arith.constant 0 : index
    %2 = vector.load %arg3[%c0_3, %c0_4] : memref<1x256xf32, #tpu.memory_space<vmem>>, vector<1x256xf32>
    %c0_5 = arith.constant 0 : index
    %c0_6 = arith.constant 0 : index
    %3 = vector.load %arg4[%c0_5, %c0_6] : memref<1x128xf32, #tpu.memory_space<vmem>>, vector<1x128xf32>
    %4 = arith.truncf %0 : vector<16x128xf32> to vector<16x128xbf16>
    %cst = arith.constant dense<0.000000e+00> : vector<16x256xf32>
    %5 = tpu.matmul %4, %1, %cst {dimension_numbers = #tpu.dot_dimension_numbers<[1], [1], [0], [0], [0, 0, 1, 0], [], []>} : vector<16x128xbf16>, vector<256x128xbf16>, vector<16x256xf32> -> vector<16x256xf32>
    %6 = vector.broadcast %2 : vector<1x256xf32> to vector<16x256xf32>
    %7 = arith.addf %5, %6 : vector<16x256xf32>
    %8 = math.tanh %7 : vector<16x256xf32>
    %9 = arith.truncf %8 : vector<16x256xf32> to vector<16x256xbf16>
    %cst_7 = arith.constant dense<0.000000e+00> : vector<16x128xf32>
    %10 = tpu.matmul %9, %1, %cst_7 {dimension_numbers = #tpu.dot_dimension_numbers<[1], [0], [0], [1], [0, 0, 1, 1], [], []>} : vector<16x256xbf16>, vector<256x128xbf16>, vector<16x128xf32> -> vector<16x128xf32>
    %11 = vector.broadcast %3 : vector<1x128xf32> to vector<16x128xf32>
    %12 = arith.addf %10, %11 : vector<16x128xf32>
    %c0_8 = arith.constant 0 : index
    %c0_9 = arith.constant 0 : index
    %13 = vector.load %arg5[%c0_8, %c0_9] : memref<16x128xf32, #tpu.memory_space<vmem>>, vector<16x128xf32>
    tpu.vector_store %arg5[%c0_8, %c0_9], %12 {strides = array<i32>} : memref<16x128xf32, #tpu.memory_space<vmem>>, vector<16x128xf32>,
    return
  }
  func.func @transform_0(%arg0: i32) -> (i32, i32) {
    %c0_i32 = arith.constant 0 : i32
    %c0_i32_0 = arith.constant 0 : i32
    return %arg0, %c0_i32 : i32, i32
  }
  func.func @transform_1(%arg0: i32) -> (i32, i32) {
    %c0_i32 = arith.constant 0 : i32
    %c0_i32_0 = arith.constant 0 : i32
    %c0_i32_1 = arith.constant 0 : i32
    return %c0_i32, %c0_i32_0 : i32, i32
  }
  func.func @transform_2(%arg0: i32) -> (i32, i32) {
    %c0_i32 = arith.constant 0 : i32
    %c0_i32_0 = arith.constant 0 : i32
    %c0_i32_1 = arith.constant 0 : i32
    return %c0_i32, %c0_i32_0 : i32, i32
  }
  func.func @transform_3(%arg0: i32) -> (i32, i32) {
    %c0_i32 = arith.constant 0 : i32
    %c0_i32_0 = arith.constant 0 : i32
    %c0_i32_1 = arith.constant 0 : i32
    return %c0_i32, %c0_i32_0 : i32, i32
  }
  func.func @transform_4(%arg0: i32) -> (i32, i32) {
    %c0_i32 = arith.constant 0 : i32
    %c0_i32_0 = arith.constant 0 : i32
    return %arg0, %c0_i32 : i32, i32
  }
}

</mosaic_0001>

<bundles_post_ra>
// kernel: tpu_custom_call.1
= control target key start
LH: loop header
LB: loop body
LE: loop exit
PB: predicated region body
PF: predicated region fallthrough
CT: control target
= control target key end

     0   :  { %9 = vsyncpa [#allocation3], 0  ;;  %s514_s0 = inlined_call_operand.hbm [shape: f32[16,128], index: 0, kind: input, shape index: {}]   ;;  %s515_s1 = inlined_call_operand.hbm [shape: bf16[256,128], index: 1, kind: input, shape index: {}]   ;;  %s516_s2 = inlined_call_operand.vmem [shape: f32[1,256], index: 2, kind: input, shape index: {}]   ;;  %s517_s3 = inlined_call_operand.vmem [shape: f32[1,128], index: 3, kind: input, shape index: {}]   ;;  %s518_s4 = inlined_call_operand.hbm [shape: f32[16,128], index: 4, kind: output, shape index: {}]  }
   0x1   :  { %10 = vsyncpa [#allocation6], 0 }
   0x2   :  { %11 = vsyncpa [#allocation4], 0  ;;  %s461_s15 = smov [#allocation2]  }
   0x3   :  { %s17_s16 = sshll.u32 %s461_s15, 4  ;;  %s18_s16 = int_to_ptr.vmem [resolvable:$true] %s17_s16 }
   0x4   :  { %s403_s17 = scalar_lea.vmem %s18_s16, 256  ;;  %p408_p1 = scmp.lt.s32.totalorder %s18_s16, %s18_s16 }
   0x5   :  { %p404_p0 = scmp.ne.s32.totalorder %s18_s16, %s403_s17  ;;  %p409_p2 = scmp.lt.s32.totalorder %s403_s17, %s403_s17 }
   0x7   :  { %p410_p3 = por %p409_p2, %p408_p1 }
   0x9   :  { %p411_p4 = pnand %p410_p3, %p404_p0 }
   0xb   :  { %414 = shalt.err (!%p411_p4)
}
   0xc   :  { %s462_s18 = smov 128   ;;  %s463_s19 = smov 8  }
   0xd   :  { %23 = dma.hbm_to_vmem [thread:$0]  %s514_s0, 256, %s18_s16, [#allocation3], %s462_s18, %s462_s18, %s463_s19  }
   0xe   :  { %s464_s22 = smov [#allocation5]  }
   0xf   :  { %s29_s23 = sshll.u32 %s464_s22, 4  ;;  %s30_s23 = int_to_ptr.vmem [resolvable:$true] %s29_s23 }
  0x10   :  { %s423_s24 = scalar_lea.vmem %s30_s23, 2048  ;;  %p428_p6 = scmp.lt.s32.totalorder %s30_s23, %s30_s23 }
  0x11   :  { %p424_p5 = scmp.ne.s32.totalorder %s30_s23, %s423_s24  ;;  %p429_p7 = scmp.lt.s32.totalorder %s423_s24, %s423_s24 }
  0x13   :  { %p430_p8 = por %p429_p7, %p428_p6 }
  0x15   :  { %p431_p9 = pnand %p430_p8, %p424_p5 }
  0x17   :  { %434 = shalt.err (!%p431_p9)
}
  0x18   :  { %s465_s25 = smov 64   ;;  %s466_s26 = smov 4  }
  0x19   :  { %35 = dma.hbm_to_vmem [thread:$0]  %s515_s1, 2048, %s30_s23, [#allocation6], %s465_s25, %s465_s25, %s466_s26  }
  0x1a   :  { %455 = dma.done.wait [#allocation3], 256  }
  0x1b   :  { %456 = vsyncadd [#allocation3], 4294967040 }
  0x1c   :  { %457 = dma.done.wait [#allocation6], 2048  }
  0x1d   :  { %458 = vsyncadd [#allocation6], 4294965248  ;;  %v371_v0 = vld [vmem:[#allocation5 + $0x78] sm:$0xff]   ;;  %v373_v2 = vld [vmem:[#allocation5 + $0x70] sm:$0xff]   ;;  %v85_v19 = vlaneseq  ;;  %s467_s30 = smov [#allocation7]  }
  0x1e   :  { %v372_v1 = vld [vmem:[#allocation5 + $0x38] sm:$0xff]   ;;  %324 = vmatprep.subr.bf16.mxu0 %v371_v0  ;;  %342 = vmatprep.subr.bf16.mxu1 %v371_v0  ;;  %v374_v3 = vld [vmem:[#allocation5 + $0x30] sm:$0xff]   ;;  %v375_v4 = vld [vmem:[#allocation5 + $0x68] sm:$0xff]   ;;  %s294_s5 = sshll.u32 %s467_s30, 4  ;;  %s295_s5 = int_to_ptr.vmem [resolvable:$true] %s294_s5 }
  0x1f   :  { %325 = vmatpush3.bf16.xpose.msra.mxu0 %v372_v1  ;;  %343 = vmatpush3.bf16.msra.mxu1 %v372_v1  ;;  %v376_v5 = vld [vmem:[#allocation5 + $0x28] sm:$0xff]   ;;  %v377_v6 = vld [vmem:[#allocation5 + $0x60] sm:$0xff]   ;;  %v379_v8 = vld [vmem:[#allocation5 + $0x58] sm:$0xff]   ;;  %v86_v20 = vshrl.u32 %v85_v19, 7  ;;  %s435_s6 = scalar_lea.vmem %s295_s5, 256  ;;  %p440_p11 = scmp.lt.s32.totalorder %s295_s5, %s295_s5 }
  0x20   :  { %326 = vmatprep.subr.bf16.mxu0 %v373_v2  ;;  %344 = vmatprep.subr.bf16.mxu1 %v373_v2  ;;  %v378_v7 = vld [vmem:[#allocation5 + $0x20] sm:$0xff]   ;;  %v47_v9 = vld [vmem:[#allocation2] sm:$0xff]  ;;  %v48_v10 = vld [vmem:[#allocation2 + $0x8] sm:$0xff]  ;;  %p436_p10 = scmp.ne.s32.totalorder %s295_s5, %s435_s6  ;;  %p441_p12 = scmp.lt.s32.totalorder %s435_s6, %s435_s6 }
  0x21   :  { %v83_v11 = vpack.c.bf16 %v48_v10, %v47_v9  ;;  %v380_v12 = vld [vmem:[#allocation5 + $0x18] sm:$0xff]   ;;  %v381_v13 = vld [vmem:[#allocation5 + $0x50] sm:$0xff]   ;;  %v383_v15 = vld [vmem:[#allocation5 + $0x48] sm:$0xff]   ;;  %v91_v21 = vsub.s32 1, %v86_v20  ;;  %v87_v23 = vsub.s32 0, %v86_v20 }
  0x22   :  { %v382_v14 = vld [vmem:[#allocation5 + $0x10] sm:$0xff]   ;;  %v384_v16 = vld [vmem:[#allocation5 + $0x8] sm:$0xff]   ;;  %v385_v17 = vld [vmem:[#allocation5 + $0x40] sm:$0xff]   ;;  %p442_p13 = por %p441_p12, %p440_p11 }
  0x23   :  { %345 = vmatpush3.bf16.msra.mxu1 %v374_v3  ;;  %340 = vmatprep.mubr.bf16.mxu0 %v83_v11  ;;  %v386_v18 = vld [vmem:[#allocation5] sm:$0xff]   ;;  %v81_v22 = vld [vmem:[%s516_s2] sm:$0x3] }
  0x24   :  { %346 = vmatprep.subr.bf16.mxu1 %v375_v4  ;;  %v92_v24 = vrot.slane %v81_v22, %v91_v21  ;;  %v88_v26 = vrot.slane %v81_v22, %v87_v23  ;;  %v323_v41 = vld [vmem:[%s517_s3] ss:$0 sm:$0xff]  ;;  %p443_p0 = pnand %p442_p13, %p436_p10 }
  0x27   :  { %327 = vmatpush3.bf16.xpose.msra.mxu0 %v374_v3  ;;  %347 = vmatpush3.bf16.msra.mxu1 %v376_v5 }
  0x28   :  { %328 = vmatprep.subr.bf16.mxu0 %v375_v4  ;;  %348 = vmatprep.subr.bf16.mxu1 %v377_v6 }
  0x2b   :  { %349 = vmatpush3.bf16.msra.mxu1 %v378_v7 }
  0x2c   :  { %350 = vmatprep.subr.bf16.mxu1 %v379_v8 }
  0x2f   :  { %329 = vmatpush3.bf16.xpose.msra.mxu0 %v376_v5  ;;  %351 = vmatpush3.bf16.msra.mxu1 %v380_v12 }
  0x30   :  { %330 = vmatprep.subr.bf16.mxu0 %v377_v6  ;;  %352 = vmatprep.subr.bf16.mxu1 %v381_v13 }
  0x33   :  { %353 = vmatpush3.bf16.msra.mxu1 %v382_v14 }
  0x34   :  { %354 = vmatprep.subr.bf16.mxu1 %v383_v15 }
  0x37   :  { %331 = vmatpush3.bf16.xpose.msra.mxu0 %v378_v7  ;;  %355 = vmatpush3.bf16.msra.mxu1 %v384_v16 }
  0x38   :  { %332 = vmatprep.subr.bf16.mxu0 %v379_v8  ;;  %356 = vmatprep.subr.bf16.mxu1 %v385_v17 }
  0x3b   :  { %357 = vmatpush3.bf16.msra.mxu1 %v386_v18 }
  0x3f   :  { %333 = vmatpush3.bf16.xpose.msra.mxu0 %v380_v12 }
  0x40   :  { %334 = vmatprep.subr.bf16.mxu0 %v381_v13 }
  0x47   :  { %335 = vmatpush3.bf16.xpose.msra.mxu0 %v382_v14 }
  0x48   :  { %336 = vmatprep.subr.bf16.mxu0 %v383_v15 }
  0x4f   :  { %337 = vmatpush3.bf16.xpose.msra.mxu0 %v384_v16 }
  0x50   :  { %338 = vmatprep.subr.bf16.mxu0 %v385_v17 }
  0x57   :  { %339 = vmatpush3.bf16.xpose.msra.mxu0 %v386_v18 }
  0x5e   :  { %341 = vmatmul.mubr.bf16.vlgmr.msra.gmra.mxu0 %v83_v11 }
 0x11e   :  { %v225_v25 = vpop.f32.mrf.mxu0 }
 0x11f   :  { %v226_v31 = vadd.f32 %v225_v25, %v88_v26 }
 0x120   :  { %v227_v27 = vpop.f32.mrf.mxu0 }
 0x121   :  { %v228_v28 = vadd.f32 %v227_v27, %v92_v24 }
 0x122   :  { %v229_v29 = vpop.f32.mrf.mxu0 }
 0x123   :  { %v230_v30 = vadd.f32 %v229_v29, %v88_v26  ;;  %387 = vtanh.f32 %v228_v28 }
 0x124   :  { %v231_v32 = vpop.f32.mrf.mxu0 }
 0x125   :  { %v232_v33 = vadd.f32 %v231_v32, %v92_v24  ;;  %389 = vtanh.f32 %v230_v30 }
 0x127   :  { %391 = vtanh.f32 %v232_v33 }
 0x128   :  { %393 = vtanh.f32 %v226_v31 }
 0x130   :  { %v388_v34 = vpop.eup %387 }
 0x132   :  { %v390_v35 = vpop.eup %389 }
 0x134   :  { %v392_v36 = vpop.eup %391 }
 0x135   :  { %v394_v37 = vpop.eup %393  ;;  %v239_v38 = vpack.c.bf16 %v392_v36, %v388_v34 }
 0x136   :  { %v238_v39 = vpack.c.bf16 %v390_v35, %v394_v37 }
 0x137   :  { %278 = vmatprep.mubr.bf16.mxu1 %v239_v38 }
 0x138   :  { %279 = vmatmul.mubr.bf16.vlgmr.msra.gmra.mxu1 %v238_v39 }
 0x1f8   :  { %v358_v40 = vpop.f32.mrf.mxu1 }
 0x1fa   :  { %v359_v42 = vpop.f32.mrf.mxu1 }
 0x1fb   :  { %v360_v43 = vadd.f32 %v359_v42, %v358_v40 }
 0x1fc   :  { %v361_v44 = vpop.f32.mrf.mxu1 }
 0x1fd   :  { %v281_v45 = vadd.f32 %v360_v43, %v323_v41 }
 0x1fe   :  { %v362_v46 = vpop.f32.mrf.mxu1 }
 0x1ff   :  { %287 = vst [vmem:[#allocation7] sm:$0xff] %v281_v45  ;;  %v363_v47 = vadd.f32 %v362_v46, %v361_v44 }
 0x201   :  { %v284_v48 = vadd.f32 %v363_v47, %v323_v41 }
 0x203   :  { %288 = vst [vmem:[#allocation7 + $0x8] sm:$0xff] %v284_v48 }
 0x204   :  { %446 = shalt.err (!%p443_p0)
}
 0x205   :  { %300 = dma.vmem_to_hbm [thread:$0]  %s295_s5, 256, %s518_s4, [#allocation4], %s462_s18, %s462_s18, %s463_s19  }
 0x206   :  { %459 = dma.done.wait [#allocation4], 256  }
 0x207   :  { %460 = vsyncadd [#allocation4], 4294967040 }
 0x208   :  { %304 = vsyncpa [#allocation3], 1 }
 0x209   :  { %305 = vsyncpa [#allocation6], 1 }
 0x20a   :  { %306 = vsyncpa [#allocation4], 1 }

// kernel: tpu_custom_call.1
= control target key start
LH: loop header
LB: loop body
LE: loop exit
PB: predicated region body
PF: predicated region fallthrough
CT: control target
= control target key end

     0   :  { %9 = vsyncpa [#allocation3], 0  ;;  %s514_s0 = inlined_call_operand.hbm [shape: f32[16,128], index: 0, kind: input, shape index: {}]   ;;  %s515_s1 = inlined_call_operand.hbm [shape: bf16[256,128], index: 1, kind: input, shape index: {}]   ;;  %s516_s2 = inlined_call_operand.vmem [shape: f32[1,256], index: 2, kind: input, shape index: {}]   ;;  %s517_s3 = inlined_call_operand.vmem [shape: f32[1,128], index: 3, kind: input, shape index: {}]   ;;  %s518_s4 = inlined_call_operand.hbm [shape: f32[16,128], index: 4, kind: output, shape index: {}]  }
   0x1   :  { %10 = vsyncpa [#allocation6], 0 }
   0x2   :  { %11 = vsyncpa [#allocation4], 0  ;;  %s461_s15 = smov [#allocation2]  }
   0x3   :  { %s17_s16 = sshll.u32 %s461_s15, 4  ;;  %s18_s16 = int_to_ptr.vmem [resolvable:$true] %s17_s16 }
   0x4   :  { %s403_s17 = scalar_lea.vmem %s18_s16, 256  ;;  %p408_p1 = scmp.lt.s32.totalorder %s18_s16, %s18_s16 }
   0x5   :  { %p404_p0 = scmp.ne.s32.totalorder %s18_s16, %s403_s17  ;;  %p409_p2 = scmp.lt.s32.totalorder %s403_s17, %s403_s17 }
   0x7   :  { %p410_p3 = por %p409_p2, %p408_p1 }
   0x9   :  { %p411_p4 = pnand %p410_p3, %p404_p0 }
   0xb   :  { %414 = shalt.err (!%p411_p4)
}
   0xc   :  { %s462_s18 = smov 128   ;;  %s463_s19 = smov 8  }
   0xd   :  { %23 = dma.hbm_to_vmem [thread:$0]  %s514_s0, 256, %s18_s16, [#allocation3], %s462_s18, %s462_s18, %s463_s19  }
   0xe   :  { %s464_s22 = smov [#allocation5]  }
   0xf   :  { %s29_s23 = sshll.u32 %s464_s22, 4  ;;  %s30_s23 = int_to_ptr.vmem [resolvable:$true] %s29_s23 }
  0x10   :  { %s423_s24 = scalar_lea.vmem %s30_s23, 2048  ;;  %p428_p6 = scmp.lt.s32.totalorder %s30_s23, %s30_s23 }
  0x11   :  { %p424_p5 = scmp.ne.s32.totalorder %s30_s23, %s423_s24  ;;  %p429_p7 = scmp.lt.s32.totalorder %s423_s24, %s423_s24 }
  0x13   :  { %p430_p8 = por %p429_p7, %p428_p6 }
  0x15   :  { %p431_p9 = pnand %p430_p8, %p424_p5 }
  0x17   :  { %434 = shalt.err (!%p431_p9)
}
  0x18   :  { %s465_s25 = smov 64   ;;  %s466_s26 = smov 4  }
  0x19   :  { %35 = dma.hbm_to_vmem [thread:$0]  %s515_s1, 2048, %s30_s23, [#allocation6], %s465_s25, %s465_s25, %s466_s26  }
  0x1a   :  { %455 = dma.done.wait [#allocation3], 256  }
  0x1b   :  { %456 = vsyncadd [#allocation3], 4294967040 }
  0x1c   :  { %457 = dma.done.wait [#allocation6], 2048  }
  0x1d   :  { %458 = vsyncadd [#allocation6], 4294965248  ;;  %v371_v0 = vld [vmem:[#allocation5 + $0x78] sm:$0xff]   ;;  %v373_v2 = vld [vmem:[#allocation5 + $0x70] sm:$0xff]   ;;  %v85_v19 = vlaneseq  ;;  %s467_s30 = smov [#allocation7]  }
  0x1e   :  { %v372_v1 = vld [vmem:[#allocation5 + $0x38] sm:$0xff]   ;;  %324 = vmatprep.subr.bf16.mxu0 %v371_v0  ;;  %342 = vmatprep.subr.bf16.mxu1 %v371_v0  ;;  %v374_v3 = vld [vmem:[#allocation5 + $0x30] sm:$0xff]   ;;  %v375_v4 = vld [vmem:[#allocation5 + $0x68] sm:$0xff]   ;;  %s294_s5 = sshll.u32 %s467_s30, 4  ;;  %s295_s5 = int_to_ptr.vmem [resolvable:$true] %s294_s5 }
  0x1f   :  { %325 = vmatpush3.bf16.xpose.msra.mxu0 %v372_v1  ;;  %343 = vmatpush3.bf16.msra.mxu1 %v372_v1  ;;  %v376_v5 = vld [vmem:[#allocation5 + $0x28] sm:$0xff]   ;;  %v377_v6 = vld [vmem:[#allocation5 + $0x60] sm:$0xff]   ;;  %v379_v8 = vld [vmem:[#allocation5 + $0x58] sm:$0xff]   ;;  %v86_v20 = vshrl.u32 %v85_v19, 7  ;;  %s435_s6 = scalar_lea.vmem %s295_s5, 256  ;;  %p440_p11 = scmp.lt.s32.totalorder %s295_s5, %s295_s5 }
  0x20   :  { %326 = vmatprep.subr.bf16.mxu0 %v373_v2  ;;  %344 = vmatprep.subr.bf16.mxu1 %v373_v2  ;;  %v378_v7 = vld [vmem:[#allocation5 + $0x20] sm:$0xff]   ;;  %v47_v9 = vld [vmem:[#allocation2] sm:$0xff]  ;;  %v48_v10 = vld [vmem:[#allocation2 + $0x8] sm:$0xff]  ;;  %p436_p10 = scmp.ne.s32.totalorder %s295_s5, %s435_s6  ;;  %p441_p12 = scmp.lt.s32.totalorder %s435_s6, %s435_s6 }
  0x21   :  { %v83_v11 = vpack.c.bf16 %v48_v10, %v47_v9  ;;  %v380_v12 = vld [vmem:[#allocation5 + $0x18] sm:$0xff]   ;;  %v381_v13 = vld [vmem:[#allocation5 + $0x50] sm:$0xff]   ;;  %v383_v15 = vld [vmem:[#allocation5 + $0x48] sm:$0xff]   ;;  %v91_v21 = vsub.s32 1, %v86_v20  ;;  %v87_v23 = vsub.s32 0, %v86_v20 }
  0x22   :  { %v382_v14 = vld [vmem:[#allocation5 + $0x10] sm:$0xff]   ;;  %v384_v16 = vld [vmem:[#allocation5 + $0x8] sm:$0xff]   ;;  %v385_v17 = vld [vmem:[#allocation5 + $0x40] sm:$0xff]   ;;  %p442_p13 = por %p441_p12, %p440_p11 }
  0x23   :  { %345 = vmatpush3.bf16.msra.mxu1 %v374_v3  ;;  %340 = vmatprep.mubr.bf16.mxu0 %v83_v11  ;;  %v386_v18 = vld [vmem:[#allocation5] sm:$0xff]   ;;  %v81_v22 = vld [vmem:[%s516_s2] sm:$0x3] }
  0x24   :  { %346 = vmatprep.subr.bf16.mxu1 %v375_v4  ;;  %v92_v24 = vrot.slane %v81_v22, %v91_v21  ;;  %v88_v26 = vrot.slane %v81_v22, %v87_v23  ;;  %v323_v41 = vld [vmem:[%s517_s3] ss:$0 sm:$0xff]  ;;  %p443_p0 = pnand %p442_p13, %p436_p10 }
  0x27   :  { %327 = vmatpush3.bf16.xpose.msra.mxu0 %v374_v3  ;;  %347 = vmatpush3.bf16.msra.mxu1 %v376_v5 }
  0x28   :  { %328 = vmatprep.subr.bf16.mxu0 %v375_v4  ;;  %348 = vmatprep.subr.bf16.mxu1 %v377_v6 }
  0x2b   :  { %349 = vmatpush3.bf16.msra.mxu1 %v378_v7 }
  0x2c   :  { %350 = vmatprep.subr.bf16.mxu1 %v379_v8 }
  0x2f   :  { %329 = vmatpush3.bf16.xpose.msra.mxu0 %v376_v5  ;;  %351 = vmatpush3.bf16.msra.mxu1 %v380_v12 }
  0x30   :  { %330 = vmatprep.subr.bf16.mxu0 %v377_v6  ;;  %352 = vmatprep.subr.bf16.mxu1 %v381_v13 }
  0x33   :  { %353 = vmatpush3.bf16.msra.mxu1 %v382_v14 }
  0x34   :  { %354 = vmatprep.subr.bf16.mxu1 %v383_v15 }
  0x37   :  { %331 = vmatpush3.bf16.xpose.msra.mxu0 %v378_v7  ;;  %355 = vmatpush3.bf16.msra.mxu1 %v384_v16 }
  0x38   :  { %332 = vmatprep.subr.bf16.mxu0 %v379_v8  ;;  %356 = vmatprep.subr.bf16.mxu1 %v385_v17 }
  0x3b   :  { %357 = vmatpush3.bf16.msra.mxu1 %v386_v18 }
  0x3f   :  { %333 = vmatpush3.bf16.xpose.msra.mxu0 %v380_v12 }
  0x40   :  { %334 = vmatprep.subr.bf16.mxu0 %v381_v13 }
  0x47   :  { %335 = vmatpush3.bf16.xpose.msra.mxu0 %v382_v14 }
  0x48   :  { %336 = vmatprep.subr.bf16.mxu0 %v383_v15 }
  0x4f   :  { %337 = vmatpush3.bf16.xpose.msra.mxu0 %v384_v16 }
  0x50   :  { %338 = vmatprep.subr.bf16.mxu0 %v385_v17 }
  0x57   :  { %339 = vmatpush3.bf16.xpose.msra.mxu0 %v386_v18 }
  0x5e   :  { %341 = vmatmul.mubr.bf16.vlgmr.msra.gmra.mxu0 %v83_v11 }
 0x11e   :  { %v225_v25 = vpop.f32.mrf.mxu0 }
 0x11f   :  { %v226_v31 = vadd.f32 %v225_v25, %v88_v26 }
 0x120   :  { %v227_v27 = vpop.f32.mrf.mxu0 }
 0x121   :  { %v228_v28 = vadd.f32 %v227_v27, %v92_v24 }
 0x122   :  { %v229_v29 = vpop.f32.mrf.mxu0 }
 0x123   :  { %v230_v30 = vadd.f32 %v229_v29, %v88_v26  ;;  %387 = vtanh.f32 %v228_v28 }
 0x124   :  { %v231_v32 = vpop.f32.mrf.mxu0 }
 0x125   :  { %v232_v33 = vadd.f32 %v231_v32, %v92_v24  ;;  %389 = vtanh.f32 %v230_v30 }
 0x127   :  { %391 = vtanh.f32 %v232_v33 }
 0x128   :  { %393 = vtanh.f32 %v226_v31 }
 0x130   :  { %v388_v34 = vpop.eup %387 }
 0x132   :  { %v390_v35 = vpop.eup %389 }
 0x134   :  { %v392_v36 = vpop.eup %391 }
 0x135   :  { %v394_v37 = vpop.eup %393  ;;  %v239_v38 = vpack.c.bf16 %v392_v36, %v388_v34 }
 0x136   :  { %v238_v39 = vpack.c.bf16 %v390_v35, %v394_v37 }
 0x137   :  { %278 = vmatprep.mubr.bf16.mxu1 %v239_v38 }
 0x138   :  { %279 = vmatmul.mubr.bf16.vlgmr.msra.gmra.mxu1 %v238_v39 }
 0x1f8   :  { %v358_v40 = vpop.f32.mrf.mxu1 }
 0x1fa   :  { %v359_v42 = vpop.f32.mrf.mxu1 }
 0x1fb   :  { %v360_v43 = vadd.f32 %v359_v42, %v358_v40 }
 0x1fc   :  { %v361_v44 = vpop.f32.mrf.mxu1 }
 0x1fd   :  { %v281_v45 = vadd.f32 %v360_v43, %v323_v41 }
 0x1fe   :  { %v362_v46 = vpop.f32.mrf.mxu1 }
 0x1ff   :  { %287 = vst [vmem:[#allocation7] sm:$0xff] %v281_v45  ;;  %v363_v47 = vadd.f32 %v362_v46, %v361_v44 }
 0x201   :  { %v284_v48 = vadd.f32 %v363_v47, %v323_v41 }
 0x203   :  { %288 = vst [vmem:[#allocation7 + $0x8] sm:$0xff] %v284_v48 }
 0x204   :  { %446 = shalt.err (!%p443_p0)
}
 0x205   :  { %300 = dma.vmem_to_hbm [thread:$0]  %s295_s5, 256, %s518_s4, [#allocation4], %s462_s18, %s462_s18, %s463_s19  }
 0x206   :  { %459 = dma.done.wait [#allocation4], 256  }
 0x207   :  { %460 = vsyncadd [#allocation4], 4294967040 }
 0x208   :  { %304 = vsyncpa [#allocation3], 1 }
 0x209   :  { %305 = vsyncpa [#allocation6], 1 }
 0x20a   :  { %306 = vsyncpa [#allocation4], 1 }

</bundles_post_ra>
